<compile_context>
chip_gen: v7x
topology: tpu7x:2x2x1
jax: 0.10.0
libtpu: 0.0.40
codegen_flags: <defaults>
</compile_context>

<pallas_src>
import functools

import jax
import jax.numpy as jnp
from jax.experimental import pallas as pl
from jax.experimental.pallas import tpu as pltpu


def _cdiv(a, b):
    return (a + b - 1) // b


def _detect_num_tensorcores():
    """Trace-time hardware query: 2 only on chips with two TensorCores."""
    try:
        kind = jax.devices()[0].device_kind.lower()
    except Exception:
        return 1
    if "v7" in kind or "v5p" in kind or " v4" in kind:
        return 2
    return 1  # v5e / v6e: single TensorCore per chip


def _dice_sums_kernel(x_ref, t_ref, num_ref, den_ref, acc_num, acc_den, *,
                      power, rows, lanes, block_rows, blocks_per_split,
                      need_mask, fold):
    c = pl.program_id(0)   # data split ("parallel": one per TensorCore on 2-TC chips)
    i = pl.program_id(1)   # block within the split (reduction axis, last)

    @pl.when(i == 0)
    def _init():
        acc_num[...] = jnp.zeros_like(acc_num)
        acc_den[...] = jnp.zeros_like(acc_den)

    # Stream in native dtype from HBM; cast to f32 on the VPU.
    x = x_ref[...].astype(jnp.float32)
    t = t_ref[...].astype(jnp.float32)

    def accumulate(xv, tv):
        pn = xv * tv
        if power == 2:
            pd = xv * xv + tv * tv          # explicit squares: minimal VPU sequence
        else:
            pd = xv ** power + tv ** power  # general fallback
        if fold and block_rows > 8:
            # Fold sublane-tile groups down to (8, lanes) with pure vector adds;
            # the reshape is (8,128)-tile aligned so it's a view.  The small
            # accumulator stays register/VMEM resident -> no full-block acc ld/st.
            pn = jnp.sum(pn.reshape(block_rows // 8, 8, lanes), axis=0)
            pd = jnp.sum(pd.reshape(block_rows // 8, 8, lanes), axis=0)
        acc_num[...] += pn
        acc_den[...] += pd

    if not need_mask:
        accumulate(x, t)
    else:
        # Logical (un-clamped) block id for this grid step.  Only tiles that
        # overlap the ragged tail (or clamped over-coverage blocks) pay for the
        # mask; full tiles take the unmasked fast path.
        row0 = (c * blocks_per_split + i) * block_rows
        is_edge = row0 + block_rows > rows

        @pl.when(jnp.logical_not(is_edge))
        def _fast():
            accumulate(x, t)

        @pl.when(is_edge)
        def _masked():
            ridx = row0 + jax.lax.broadcasted_iota(jnp.int32, x.shape, 0)
            keep = ridx < rows
            accumulate(jnp.where(keep, x, 0.0), jnp.where(keep, t, 0.0))

    @pl.when(i == pl.num_programs(1) - 1)
    def _flush():
        # Finish the reduction in-kernel (XLU slot is idle); one scalar / split.
        num_ref[...] = jnp.sum(acc_num[...]).reshape(1, 1, 1)
        den_ref[...] = jnp.sum(acc_den[...]).reshape(1, 1, 1)


def _binary_dice_loss_impl(x, target, power, reduction, block_bytes, num_splits):
    assert x.shape[0] == target.shape[0], "x & target batch size don't match"
    assert x.size == target.size, "x & target element counts don't match"
    del reduction  # dead code in the original forward (after `return loss`)

    total = int(x.size)
    xf = x.reshape(-1)
    tf = target.reshape(-1)

    # ---- lane-dense 2-D view of the flattened data (free reshape) -----------
    lanes = None
    for cand in (512, 256, 128):
        if total % cand == 0 and (total // cand) % 8 == 0:
            lanes = cand
            break
    if lanes is None:
        for cand in (512, 256, 128):
            if total % cand == 0:
                lanes = cand
                break
    if lanes is None:
        # TODO(synk): rare path (size not a multiple of 128) still materializes
        # padded copies (~1 extra HBM pass per input); a tiny tail side-pass
        # would avoid it but is not worth the complexity here.
        lanes = 128
        pad = (-total) % 128
        xf = jnp.pad(xf, (0, pad))
        tf = jnp.pad(tf, (0, pad))
        total += pad

    rows = total // lanes
    x2 = xf.reshape(rows, lanes)
    t2 = tf.reshape(rows, lanes)

    # ---- block / grid geometry -----------------------------------------------
    # ~2 MiB per input per block in the NATIVE dtype: big enough to amortize the
    # ~0.35us/step grid overhead, small enough that 2 inputs x 2 pipeline
    # buffers + f32 temporaries stay well under v7x's 64 MiB-per-TC VMEM.
    if block_bytes is None:
        block_bytes = 2 * 1024 * 1024
    itemsize = max(x.dtype.itemsize, target.dtype.itemsize)
    target_rows = max(8, (block_bytes // (lanes * itemsize)) // 8 * 8)
    block_rows = rows if rows <= target_rows else target_rows

    nblocks = _cdiv(rows, block_rows)

    # Split the data across TensorCores only where there are two of them.
    if num_splits is None:
        num_splits = _detect_num_tensorcores()
    num_splits = num_splits if nblocks >= 2 else 1
    bps = _cdiv(nblocks, num_splits)          # blocks per split

    need_mask = (nblocks * block_rows != rows) or (num_splits * bps != nblocks)
    fold = (block_rows % 8 == 0)
    acc_rows = 8 if fold else block_rows      # tiny accumulators

    if num_splits * bps == nblocks:
        in_idx = lambda c, i: (c * bps + i, 0)
    else:
        # Clamp over-coverage to a valid block; the kernel masks it to zero.
        in_idx = lambda c, i: (jnp.minimum(c * bps + i, nblocks - 1), 0)

    kernel = functools.partial(
        _dice_sums_kernel,
        power=power, rows=rows, lanes=lanes, block_rows=block_rows,
        blocks_per_split=bps, need_mask=need_mask, fold=fold)

    num_parts, den_parts = pl.pallas_call(
        kernel,
        out_shape=(
            jax.ShapeDtypeStruct((num_splits, 1, 1), jnp.float32),
            jax.ShapeDtypeStruct((num_splits, 1, 1), jnp.float32),
        ),
        grid_spec=pltpu.PrefetchScalarGridSpec(
            num_scalar_prefetch=0,
            grid=(num_splits, bps),
            in_specs=[
                pl.BlockSpec((block_rows, lanes), in_idx),
                pl.BlockSpec((block_rows, lanes), in_idx),
            ],
            out_specs=[
                pl.BlockSpec((1, 1, 1), lambda c, i: (c, 0, 0)),
                pl.BlockSpec((1, 1, 1), lambda c, i: (c, 0, 0)),
            ],
            scratch_shapes=[
                pltpu.VMEM((acc_rows, lanes), jnp.float32),   # num accumulator
                pltpu.VMEM((acc_rows, lanes), jnp.float32),   # den accumulator
            ],
        ),
        compiler_params=pltpu.CompilerParams(
            dimension_semantics=("parallel", "arbitrary"),
            vmem_limit_bytes=48 * 1024 * 1024,
        ),
    )(x2, t2)

    num_s = jnp.sum(num_parts)
    den_s = jnp.sum(den_parts)

    # PyTorch returns Python int 0 when den.item() == 0; traced 0.0 here.
    den_safe = jnp.where(den_s == 0.0, 1.0, den_s)
    loss = -jnp.log(2.0 * num_s / den_safe + 1e-05)
    return jnp.where(den_s == 0.0, 0.0, loss)


@functools.partial(
    jax.jit, static_argnames=("power", "reduction", "block_bytes", "num_splits"))
def binary_dice_loss(x, target, power=2, reduction="mean",
                     block_bytes=None, num_splits=None):
    """Pallas implementation of BinaryDiceLoss.forward (returns an f32 scalar)."""
    return _binary_dice_loss_impl(x, target, power, reduction, block_bytes,
                                  num_splits)


def _reference(x, target):
    xf = x.astype(jnp.float32).reshape(-1)
    tf = target.astype(jnp.float32).reshape(-1)
    num = jnp.sum(xf * tf)
    den = jnp.sum(xf ** 2 + tf ** 2)
    return -jnp.log(2.0 * num / den + 1e-05)


if __name__ == "__main__":
    key = jax.random.PRNGKey(0)
    kx, kt, kx2, kt2 = jax.random.split(key, 4)

    # 1) Small NCHW segmentation-style case.
    x = jax.nn.sigmoid(jax.random.normal(kx, (2, 4, 16, 16), dtype=jnp.float32))
    target = (jax.random.uniform(kt, (2, 4, 16, 16)) > 0.5).astype(jnp.float32)
    loss = jax.block_until_ready(binary_dice_loss(x, target))
    loss_ref = _reference(x, target)
    assert jnp.allclose(loss, loss_ref, rtol=1e-4, atol=1e-6), (loss, loss_ref)

    # 2) Larger bf16 case: native-dtype streaming, ~2 MiB native block.
    xb = jax.nn.sigmoid(
        jax.random.normal(kx2, (2, 4, 512, 256), dtype=jnp.float32)
    ).astype(jnp.bfloat16)
    tb = (jax.random.uniform(kt2, (2, 4, 512, 256)) > 0.5).astype(jnp.bfloat16)
    loss_b = jax.block_until_ready(binary_dice_loss(xb, tb))
    loss_b_ref = _reference(xb, tb)
    assert jnp.allclose(loss_b, loss_b_ref, rtol=1e-4, atol=1e-6), (loss_b, loss_b_ref)

    # 3) Same data, forced small blocks + 2-way split: exercises the
    #    multi-block pipeline, grid-index clamping and the gated ragged-tail
    #    mask on every TPU generation.
    loss_c = jax.block_until_ready(
        binary_dice_loss(xb, tb, block_bytes=48 * 1024, num_splits=2))
    assert jnp.allclose(loss_c, loss_b_ref, rtol=1e-4, atol=1e-6), (loss_c, loss_b_ref)

    # 4) Ragged total (not a multiple of 128): exercises the padded fallback.
    xd = jax.random.uniform(kx, (2, 3, 5, 7), dtype=jnp.float32)
    td = (jax.random.uniform(kt, (2, 3, 5, 7)) > 0.5).astype(jnp.float32)
    loss_d = jax.block_until_ready(binary_dice_loss(xd, td))
    loss_d_ref = _reference(xd, td)
    assert jnp.allclose(loss_d, loss_d_ref, rtol=1e-4, atol=1e-6), (loss_d, loss_d_ref)

    print("KERNEL_OK")
</pallas_src>

<mosaic_0001>
module attributes {stable_mosaic.version = 11 : i64} {
  func.func @_dice_sums_kernel(%arg0: i32, %arg1: i32, %arg2: memref<8x256xf32, #tpu.memory_space<vmem>>, %arg3: memref<8x256xf32, #tpu.memory_space<vmem>>, %arg4: memref<1x1x1xf32, #tpu.memory_space<vmem>>, %arg5: memref<1x1x1xf32, #tpu.memory_space<vmem>>, %arg6: memref<8x256xf32, #tpu.memory_space<vmem>>, %arg7: memref<8x256xf32, #tpu.memory_space<vmem>>) attributes {dimension_semantics = [#tpu.dimension_semantics<parallel>, #tpu.dimension_semantics<arbitrary>], iteration_bounds = array<i64: 1, 1>, scalar_prefetch = 0 : i64, scratch_operands = 2 : i64, tpu.core_type = #tpu.core_type<tc>, window_params = [{transform_indices = @transform_0, window_bounds = array<i64: 8, 256>}, {transform_indices = @transform_1, window_bounds = array<i64: 8, 256>}, {transform_indices = @transform_2, window_bounds = array<i64: 1, 1, 1>}, {transform_indices = @transform_3, window_bounds = array<i64: 1, 1, 1>}]} {
    %c0_i32 = arith.constant 0 : i32
    %0 = arith.cmpi eq, %arg1, %c0_i32 : i32
    %1 = arith.extui %0 : i1 to i32
    %c0_i32_0 = arith.constant 0 : i32
    %2 = arith.cmpi ne, %1, %c0_i32_0 : i32
    scf.if %2 {
      %cst = arith.constant 0.000000e+00 : f32
      %18 = vector.broadcast %cst : f32 to vector<8x256xf32>
      %c0_14 = arith.constant 0 : index
      %c0_15 = arith.constant 0 : index
      %19 = vector.load %arg6[%c0_14, %c0_15] : memref<8x256xf32, #tpu.memory_space<vmem>>, vector<8x256xf32>
      tpu.vector_store %arg6[%c0_14, %c0_15], %18 {strides = array<i32>} : memref<8x256xf32, #tpu.memory_space<vmem>>, vector<8x256xf32>,
      %cst_16 = arith.constant 0.000000e+00 : f32
      %20 = vector.broadcast %cst_16 : f32 to vector<8x256xf32>
      %c0_17 = arith.constant 0 : index
      %c0_18 = arith.constant 0 : index
      %21 = vector.load %arg7[%c0_17, %c0_18] : memref<8x256xf32, #tpu.memory_space<vmem>>, vector<8x256xf32>
      tpu.vector_store %arg7[%c0_17, %c0_18], %20 {strides = array<i32>} : memref<8x256xf32, #tpu.memory_space<vmem>>, vector<8x256xf32>,
    } else {
    }
    %c0 = arith.constant 0 : index
    %c0_1 = arith.constant 0 : index
    %3 = vector.load %arg2[%c0, %c0_1] : memref<8x256xf32, #tpu.memory_space<vmem>>, vector<8x256xf32>
    %c0_2 = arith.constant 0 : index
    %c0_3 = arith.constant 0 : index
    %4 = vector.load %arg3[%c0_2, %c0_3] : memref<8x256xf32, #tpu.memory_space<vmem>>, vector<8x256xf32>
    %5 = arith.mulf %3, %4 : vector<8x256xf32>
    %6 = arith.mulf %3, %3 : vector<8x256xf32>
    %7 = arith.mulf %4, %4 : vector<8x256xf32>
    %8 = arith.addf %6, %7 : vector<8x256xf32>
    %c0_4 = arith.constant 0 : index
    %c0_5 = arith.constant 0 : index
    %9 = vector.load %arg6[%c0_4, %c0_5] : memref<8x256xf32, #tpu.memory_space<vmem>>, vector<8x256xf32>
    %10 = arith.addf %9, %5 : vector<8x256xf32>
    %c0_6 = arith.constant 0 : index
    %c0_7 = arith.constant 0 : index
    %11 = vector.load %arg6[%c0_6, %c0_7] : memref<8x256xf32, #tpu.memory_space<vmem>>, vector<8x256xf32>
    tpu.vector_store %arg6[%c0_6, %c0_7], %10 {strides = array<i32>} : memref<8x256xf32, #tpu.memory_space<vmem>>, vector<8x256xf32>,
    %c0_8 = arith.constant 0 : index
    %c0_9 = arith.constant 0 : index
    %12 = vector.load %arg7[%c0_8, %c0_9] : memref<8x256xf32, #tpu.memory_space<vmem>>, vector<8x256xf32>
    %13 = arith.addf %12, %8 : vector<8x256xf32>
    %c0_10 = arith.constant 0 : index
    %c0_11 = arith.constant 0 : index
    %14 = vector.load %arg7[%c0_10, %c0_11] : memref<8x256xf32, #tpu.memory_space<vmem>>, vector<8x256xf32>
    tpu.vector_store %arg7[%c0_10, %c0_11], %13 {strides = array<i32>} : memref<8x256xf32, #tpu.memory_space<vmem>>, vector<8x256xf32>,
    %c0_i32_12 = arith.constant 0 : i32
    %15 = arith.cmpi eq, %arg1, %c0_i32_12 : i32
    %16 = arith.extui %15 : i1 to i32
    %c0_i32_13 = arith.constant 0 : i32
    %17 = arith.cmpi ne, %16, %c0_i32_13 : i32
    scf.if %17 {
      %c0_14 = arith.constant 0 : index
      %c0_15 = arith.constant 0 : index
      %18 = vector.load %arg6[%c0_14, %c0_15] : memref<8x256xf32, #tpu.memory_space<vmem>>, vector<8x256xf32>
      %19 = vector.shape_cast %18 : vector<8x256xf32> to vector<1x8x256xf32>
      %cst = arith.constant dense<0.000000e+00> : vector<1xf32>
      %20 = vector.multi_reduction <add>, %19, %cst [1, 2] : vector<1x8x256xf32> to vector<1xf32>
      %21 = vector.shape_cast %20 : vector<1xf32> to vector<1x1x1xf32>
      %22 = vector.extract %21[0, 0, 0] : f32 from vector<1x1x1xf32>
      %23 = vector.broadcast %22 : f32 to vector<1x1x1xf32>
      %c0_16 = arith.constant 0 : index
      %c0_17 = arith.constant 0 : index
      %c0_18 = arith.constant 0 : index
      %24 = vector.load %arg4[%c0_16, %c0_17, %c0_18] : memref<1x1x1xf32, #tpu.memory_space<vmem>>, vector<1x1x1xf32>
      tpu.vector_store %arg4[%c0_16, %c0_17, %c0_18], %23 {strides = array<i32>} : memref<1x1x1xf32, #tpu.memory_space<vmem>>, vector<1x1x1xf32>,
      %c0_19 = arith.constant 0 : index
      %c0_20 = arith.constant 0 : index
      %25 = vector.load %arg7[%c0_19, %c0_20] : memref<8x256xf32, #tpu.memory_space<vmem>>, vector<8x256xf32>
      %26 = vector.shape_cast %25 : vector<8x256xf32> to vector<1x8x256xf32>
      %cst_21 = arith.constant dense<0.000000e+00> : vector<1xf32>
      %27 = vector.multi_reduction <add>, %26, %cst_21 [1, 2] : vector<1x8x256xf32> to vector<1xf32>
      %28 = vector.shape_cast %27 : vector<1xf32> to vector<1x1x1xf32>
      %29 = vector.extract %28[0, 0, 0] : f32 from vector<1x1x1xf32>
      %30 = vector.broadcast %29 : f32 to vector<1x1x1xf32>
      %c0_22 = arith.constant 0 : index
      %c0_23 = arith.constant 0 : index
      %c0_24 = arith.constant 0 : index
      %31 = vector.load %arg5[%c0_22, %c0_23, %c0_24] : memref<1x1x1xf32, #tpu.memory_space<vmem>>, vector<1x1x1xf32>
      tpu.vector_store %arg5[%c0_22, %c0_23, %c0_24], %30 {strides = array<i32>} : memref<1x1x1xf32, #tpu.memory_space<vmem>>, vector<1x1x1xf32>,
    } else {
    }
    return
  }
  func.func @transform_0(%arg0: i32, %arg1: i32) -> (i32, i32) {
    %c1_i32 = arith.constant 1 : i32
    %0 = arith.muli %arg0, %c1_i32 : i32
    %1 = arith.addi %0, %arg1 : i32
    %c0_i32 = arith.constant 0 : i32
    %c0_i32_0 = arith.constant 0 : i32
    return %1, %c0_i32 : i32, i32
  }
  func.func @transform_1(%arg0: i32, %arg1: i32) -> (i32, i32) {
    %c1_i32 = arith.constant 1 : i32
    %0 = arith.muli %arg0, %c1_i32 : i32
    %1 = arith.addi %0, %arg1 : i32
    %c0_i32 = arith.constant 0 : i32
    %c0_i32_0 = arith.constant 0 : i32
    return %1, %c0_i32 : i32, i32
  }
  func.func @transform_2(%arg0: i32, %arg1: i32) -> (i32, i32, i32) {
    %c0_i32 = arith.constant 0 : i32
    %c0_i32_0 = arith.constant 0 : i32
    %c0_i32_1 = arith.constant 0 : i32
    return %arg0, %c0_i32, %c0_i32_0 : i32, i32, i32
  }
  func.func @transform_3(%arg0: i32, %arg1: i32) -> (i32, i32, i32) {
    %c0_i32 = arith.constant 0 : i32
    %c0_i32_0 = arith.constant 0 : i32
    %c0_i32_1 = arith.constant 0 : i32
    return %arg0, %c0_i32, %c0_i32_0 : i32, i32, i32
  }
}

</mosaic_0001>

<bundles_post_ra>
// kernel: binary_dice_loss.1
= control target key start
LH: loop header
LB: loop body
LE: loop exit
PB: predicated region body
PF: predicated region fallthrough
CT: control target
= control target key end

     0   :  { %9 = vsyncpa [#allocation5], 0  ;;  %s273_s0 = inlined_call_operand.vmem [shape: f32[8,256], index: 0, kind: input, shape index: {}]   ;;  %s274_s1 = inlined_call_operand.vmem [shape: f32[8,256], index: 1, kind: input, shape index: {}]   ;;  %s275_s2 = inlined_call_operand.hbm [shape: f32[1,1,1], index: 2, kind: output, shape index: {0}]   ;;  %s276_s3 = inlined_call_operand.hbm [shape: f32[1,1,1], index: 3, kind: output, shape index: {1}]  }
   0x1   :  { %v63_v0 = vld [vmem:[%s273_s0] sm:$0xff]  ;;  %v64_v1 = vld [vmem:[%s273_s0 + $0x8] sm:$0xff] }
   0x2   :  { %v65_v2 = vld [vmem:[%s274_s1] sm:$0xff]  ;;  %v66_v3 = vld [vmem:[%s274_s1 + $0x8] sm:$0xff]  ;;  %v69_v5 = vmul.f32 %v63_v0, %v63_v0  ;;  %v70_v6 = vmul.f32 %v64_v1, %v64_v1 }
   0x3   :  { %v67_v4 = vmul.f32 %v65_v2, %v63_v0  ;;  %v71_v7 = vmul.f32 %v65_v2, %v65_v2 }
   0x4   :  { %10 = vsyncpa [#allocation7], 0  ;;  %v68_v8 = vmul.f32 %v66_v3, %v64_v1  ;;  %v72_v9 = vmul.f32 %v66_v3, %v66_v3  ;;  %s213_s0 = smov [#allocation4]   ;;  %vm103_vm0 = vcmask 0   ;;  %s214_s21 = smov [#allocation6]  }
   0x5   :  { %v73_v10 = vadd.f32 %v71_v7, %v69_v5  ;;  %s125_s1 = sshll.u32 %s213_s0, 4  ;;  %s135_s22 = sshll.u32 %s214_s21, 4  ;;  %s126_s1 = int_to_ptr.vmem [resolvable:$true] %s125_s1  ;;  %s136_s22 = int_to_ptr.vmem [resolvable:$true] %s135_s22 }
   0x6   :  { %v92_v11 = vadd.f32 %v68_v8, %v67_v4  ;;  %v74_v12 = vadd.f32 %v72_v9, %v70_v6  ;;  %s165_s23 = scalar_lea.vmem %s126_s1, 16  ;;  %s169_s24 = scalar_lea.vmem %s126_s1, 32 }
   0x7   :  { %p166_p0 = scmp.ne.s32.totalorder %s126_s1, %s165_s23  ;;  %p170_p1 = scmp.lt.s32.totalorder %s126_s1, %s126_s1 }
   0x8   :  { %93 = vadd.xlane.f32.xlu0 %v92_v11  ;;  %v107_v13 = vadd.f32 %v74_v12, %v73_v10  ;;  %p171_p2 = scmp.lt.s32.totalorder %s169_s24, %s165_s23 }
   0xa   :  { %p172_p3 = por %p171_p2, %p170_p1 }
   0xc   :  { %108 = vadd.xlane.f32.xlu0 %v107_v13  ;;  %p173_p4 = pnand %p172_p3, %p166_p0 }
  0x95   :  { %v94_v14 = vpop.xlane.xlu0 %93 }
  0x96   :  { %v95_v15 = vrot.slane %v94_v14, 4 }
  0x98   :  { %v96_v16 = vadd.f32 %v95_v15, %v94_v14 }
  0x99   :  { %v109_v17 = vpop.xlane.xlu0 %108 }
  0x9a   :  { %v97_v18 = vrot.slane %v96_v16, 2  ;;  %v110_v19 = vrot.slane %v109_v17, 4 }
  0x9c   :  { %v111_v20 = vadd.f32 %v110_v19, %v109_v17  ;;  %v98_v21 = vadd.f32 %v97_v18, %v96_v16 }
  0x9e   :  { %v112_v22 = vrot.slane %v111_v20, 2  ;;  %v99_v23 = vrot.slane %v98_v21, 1 }
  0xa0   :  { %v113_v24 = vadd.f32 %v112_v22, %v111_v20  ;;  %v100_v25 = vadd.f32 %v99_v23, %v98_v21 }
  0xa2   :  { %159 = vpush %v100_v25  ;;  %v114_v26 = vrot.slane %v113_v24, 1 }
  0xa4   :  { %v115_v27 = vadd.f32 %v114_v26, %v113_v24 }
  0xa6   :  { %161 = vpush %v115_v27 }
  0xd3   :  { %s160_s20 = spop %159 }
  0xd4   :  { %v102_v28 = vstv %s160_s20 }
  0xd5   :  { %104 = vst.msk [vmem:[#allocation4] sm:$0x1] %vm103_vm0, %v102_v28 }
  0xd6   :  { %176 = shalt.err (!%p173_p4)
}
  0xd7   :  { %s177_s27 = scalar_lea.hbm %s275_s2, 16 }
  0xd8   :  { %p178_p5 = scmp.ne.s32.totalorder %s275_s2, %s177_s27  ;;  %p181_p6 = scmp.lt.u32.totalorder %s177_s27, %s275_s2 }
  0xda   :  { %p183_p7 = pnand %p181_p6, %p178_p5 }
  0xdc   :  { %186 = shalt.err (!%p183_p7)
}
  0xdd   :  { %128 = dma.vmem_to_hbm [thread:$0]  %s126_s1, 16, %s275_s2, [#allocation5]  }
  0xde   :  { %s162_s7 = spop %161  ;;  %s187_s8 = scalar_lea.vmem %s136_s22, 16 }
  0xdf   :  { %v117_v29 = vstv %s162_s7  ;;  %p188_p8 = scmp.ne.s32.totalorder %s136_s22, %s187_s8  ;;  %s191_s9 = scalar_lea.vmem %s136_s22, 32 }
  0xe0   :  { %118 = vst.msk [vmem:[#allocation6] sm:$0x1] %vm103_vm0, %v117_v29  ;;  %p192_p9 = scmp.lt.s32.totalorder %s136_s22, %s136_s22  ;;  %p193_p10 = scmp.lt.s32.totalorder %s191_s9, %s187_s8 }
  0xe2   :  { %p194_p11 = por %p193_p10, %p192_p9 }
  0xe4   :  { %p195_p12 = pnand %p194_p11, %p188_p8 }
  0xe6   :  { %198 = shalt.err (!%p195_p12)
}
  0xe7   :  { %s199_s12 = scalar_lea.hbm %s276_s3, 16 }
  0xe8   :  { %p200_p13 = scmp.ne.s32.totalorder %s276_s3, %s199_s12  ;;  %p203_p0 = scmp.lt.u32.totalorder %s199_s12, %s276_s3 }
  0xea   :  { %p205_p1 = pnand %p203_p0, %p200_p13 }
  0xec   :  { %208 = shalt.err (!%p205_p1)
}
  0xed   :  { %138 = dma.vmem_to_hbm [thread:$0]  %s136_s22, 16, %s276_s3, [#allocation7]  }
  0xee   :  { %209 = dma.done.wait [#allocation5], 16  }
  0xef   :  { %210 = vsyncadd [#allocation5], 4294967280 }
  0xf0   :  { %211 = dma.done.wait [#allocation7], 16  }
  0xf1   :  { %212 = vsyncadd [#allocation7], 4294967280 }
  0xf2   :  { %145 = vsyncpa [#allocation5], 1 }
  0xf3   :  { %146 = vsyncpa [#allocation7], 1 }

</bundles_post_ra>
